<compile_context>
chip_gen: v6e
topology: v6e:2x2x1
jax: 0.10.0
libtpu: 0.0.40
codegen_flags: <defaults>
</compile_context>

<pallas_src>
import jax
import jax.numpy as jnp
from jax.scipy.linalg import solve_triangular
from jax.experimental import pallas as pl
from jax.experimental.pallas import tpu as pltpu


def _clickp_kernel(k_ref, xt_ref, action_ref, w_ref, subset_ref, pclick_ref):
    """k: (1,) SMEM int32.  xt: (1, du).  action: (H, da).  w: (H, du+da).

    subset / pclick outputs: (H, 1) columns (heads along sublanes)."""
    H, _ = action_ref.shape
    du = xt_ref.shape[-1]

    w = w_ref[...]                                           # (H, D)
    # Fused build_phi: logit_i = xt . w_i[:du] + action_i . w_i[du:]
    logits = (jnp.sum(xt_ref[...] * w[:, :du], axis=-1, keepdims=True)
              + jnp.sum(action_ref[...] * w[:, du:], axis=-1, keepdims=True))
    p = jax.nn.sigmoid(logits)                               # (H, 1), f32 on EUP

    # Rank-count top-K selection (== mindex(): higher pclick first, ties break
    # toward the lower head index).  p_mat_t is a bit-exact transposed copy of
    # p, so both comparison orientations see identical values.
    p_mat = jnp.broadcast_to(p, (H, H))                      # [j, i] = p[j]
    p_mat_t = p_mat.T                                        # [j, i] = p[i]
    j_idx = jax.lax.broadcasted_iota(jnp.int32, (H, H), 0)
    i_idx = jax.lax.broadcasted_iota(jnp.int32, (H, H), 1)
    # beats[j, i] == True  iff head i outranks head j.
    beats = (p_mat_t > p_mat) | ((p_mat_t == p_mat) & (i_idx < j_idx))
    rank = jnp.sum(beats.astype(jnp.int32), axis=-1, keepdims=True)   # (H, 1)

    k = k_ref[0]                                             # runtime top-K
    subset_ref[...] = (rank < k).astype(jnp.int32)           # encoder() one-hot
    pclick_ref[...] = p


def clickp_pallas(xt, action, w, K):
    """xt: (duser,), action: (heads, daction), w: (heads, duser+daction).

    Returns (subset (heads,) int32, pclick (heads,) f32)."""
    heads, daction = action.shape
    duser = xt.shape[-1]
    D = duser + daction
    assert w.shape == (heads, D)

    xt2d = xt.reshape(1, duser).astype(jnp.float32)
    action = action.astype(jnp.float32)
    w = w.astype(jnp.float32)
    # Runtime scalar (SMEM): distinct K values do NOT recompile the kernel.
    # NOTE: assumes 0 < K <= heads (matching the original module's usage).
    k_arr = jnp.asarray(K, jnp.int32).reshape((1,))

    subset, pclick = pl.pallas_call(
        _clickp_kernel,
        out_shape=(
            jax.ShapeDtypeStruct((heads, 1), jnp.int32),
            jax.ShapeDtypeStruct((heads, 1), jnp.float32),
        ),
        in_specs=[
            pl.BlockSpec(memory_space=pltpu.MemorySpace.SMEM),   # K
            pl.BlockSpec(memory_space=pltpu.MemorySpace.VMEM),   # xt
            pl.BlockSpec(memory_space=pltpu.MemorySpace.VMEM),   # action
            pl.BlockSpec(memory_space=pltpu.MemorySpace.VMEM),   # w
        ],
        out_specs=(
            pl.BlockSpec(memory_space=pltpu.MemorySpace.VMEM),
            pl.BlockSpec(memory_space=pltpu.MemorySpace.VMEM),
        ),
        cost_estimate=pl.CostEstimate(
            flops=2 * heads * D + 8 * heads * heads,
            transcendentals=heads,
            bytes_accessed=4 * (heads * D + heads * daction + duser
                                + 2 * heads + 1)),
    )(k_arr, xt2d, action, w)
    return subset[:, 0], pclick[:, 0]


def sample_weights(mean, va, key):
    """Thompson sample: w_i ~ MVN(mean_i, inv(va_i)); va_i is the precision.

    With va = L L^T,  w = mean + L^{-T} z  has covariance (L L^T)^{-1} = va^{-1},
    so no explicit inverse is ever formed."""
    L = jnp.linalg.cholesky(va)                              # (H, D, D)
    z = jax.random.normal(key, mean.shape, mean.dtype)
    solve = jax.vmap(
        lambda Lh, zh: solve_triangular(Lh, zh, lower=True, trans='T'))
    return mean + solve(L, z)


def clickp_forward(mean, va, xt, action, K, key):
    """Pallas-backed clickp.forward: returns the one-hot subset, length heads."""
    w = sample_weights(mean, va, key)
    subset, _ = clickp_pallas(xt, action, w, K)
    return subset


def clickp_reference(phi, w, K):
    """Pure-JAX reference of the post-sampling part of clickp.forward."""
    logits = jnp.sum(phi * w, axis=1)
    pclick = jax.nn.sigmoid(logits)
    H = pclick.shape[0]
    idx = jnp.arange(H)
    beats = (pclick[:, None] > pclick[None, :]) | (
        (pclick[:, None] == pclick[None, :]) & (idx[:, None] < idx[None, :]))
    rank = jnp.sum(beats.astype(jnp.int32), axis=0)
    return (rank < K).astype(jnp.int32), pclick


if __name__ == "__main__":
    duser, daction, heads, K = 16, 16, 4, 2
    D = duser + daction

    key = jax.random.PRNGKey(0)
    k_mean, k_va, k_xt, k_act, k_samp = jax.random.split(key, 5)

    mean = jax.random.normal(k_mean, (heads, D), jnp.float32)
    A = jax.random.normal(k_va, (heads, D, D), jnp.float32) * 0.1
    # positive-definite precision matrices per head
    va = jnp.einsum("hij,hkj->hik", A, A) + 2.0 * jnp.eye(D, dtype=jnp.float32)[None]
    xt = jax.random.normal(k_xt, (duser,), jnp.float32)
    action = jax.random.normal(k_act, (heads, daction), jnp.float32)

    subset = clickp_forward(mean, va, xt, action, K, k_samp)
    subset = jax.block_until_ready(subset)

    # Validate against the pure-JAX reference using the SAME sampled weights.
    w = sample_weights(mean, va, k_samp)
    k_subset, k_pclick = clickp_pallas(xt, action, w, K)
    phi = jnp.concatenate(
        [jnp.broadcast_to(xt[None, :], (heads, duser)), action], axis=1)
    ref_subset, ref_pclick = clickp_reference(phi, w, K)

    assert subset.shape == (heads,) and subset.dtype == jnp.int32
    assert int(subset.sum()) == K
    assert bool(jnp.array_equal(subset, ref_subset))
    assert bool(jnp.array_equal(k_subset, ref_subset))
    assert jnp.allclose(k_pclick, ref_pclick, atol=1e-5, rtol=1e-5)

    print("KERNEL_OK")
</pallas_src>

<mosaic_0001>
module attributes {stable_mosaic.version = 11 : i64} {
  func.func @_clickp_kernel(%arg0: memref<1xi32, #tpu.memory_space<smem>>, %arg1: memref<1x16xf32, #tpu.memory_space<vmem>>, %arg2: memref<4x16xf32, #tpu.memory_space<vmem>>, %arg3: memref<4x32xf32, #tpu.memory_space<vmem>>, %arg4: memref<4x1xi32, #tpu.memory_space<vmem>>, %arg5: memref<4x1xf32, #tpu.memory_space<vmem>>) attributes {dimension_semantics = [], scalar_prefetch = 0 : i64, scratch_operands = 0 : i64, tpu.core_type = #tpu.core_type<tc>} {
    %c0 = arith.constant 0 : index
    %c0_0 = arith.constant 0 : index
    %0 = vector.load %arg3[%c0, %c0_0] : memref<4x32xf32, #tpu.memory_space<vmem>>, vector<4x32xf32>
    %c0_1 = arith.constant 0 : index
    %c0_2 = arith.constant 0 : index
    %1 = vector.load %arg1[%c0_1, %c0_2] : memref<1x16xf32, #tpu.memory_space<vmem>>, vector<1x16xf32>
    %2 = vector.extract_strided_slice %0 {offsets = [0, 0], sizes = [4, 16], strides = [1, 1]} : vector<4x32xf32> to vector<4x16xf32>
    %3 = vector.broadcast %1 : vector<1x16xf32> to vector<4x16xf32>
    %4 = arith.mulf %3, %2 : vector<4x16xf32>
    %cst = arith.constant dense<0.000000e+00> : vector<4xf32>
    %5 = vector.multi_reduction <add>, %4, %cst [1] : vector<4x16xf32> to vector<4xf32>
    %6 = vector.shape_cast %5 : vector<4xf32> to vector<4x1xf32>
    %c0_3 = arith.constant 0 : index
    %c0_4 = arith.constant 0 : index
    %7 = vector.load %arg2[%c0_3, %c0_4] : memref<4x16xf32, #tpu.memory_space<vmem>>, vector<4x16xf32>
    %8 = vector.extract_strided_slice %0 {offsets = [0, 16], sizes = [4, 16], strides = [1, 1]} : vector<4x32xf32> to vector<4x16xf32>
    %9 = arith.mulf %7, %8 : vector<4x16xf32>
    %cst_5 = arith.constant dense<0.000000e+00> : vector<4xf32>
    %10 = vector.multi_reduction <add>, %9, %cst_5 [1] : vector<4x16xf32> to vector<4xf32>
    %11 = vector.shape_cast %10 : vector<4xf32> to vector<4x1xf32>
    %12 = arith.addf %6, %11 : vector<4x1xf32>
    %13 = arith.negf %12 : vector<4x1xf32>
    %14 = math.exp %13 : vector<4x1xf32>
    %cst_6 = arith.constant 1.000000e+00 : f32
    %15 = vector.broadcast %cst_6 : f32 to vector<4x1xf32>
    %16 = arith.addf %15, %14 : vector<4x1xf32>
    %17 = arith.divf %15, %16 : vector<4x1xf32>
    %18 = vector.shape_cast %17 : vector<4x1xf32> to vector<4x1xf32>
    %19 = vector.broadcast %18 : vector<4x1xf32> to vector<4x4xf32>
    %20 = tpu.transpose %19, [1, 0] : vector<4x4xf32> -> vector<4x4xf32>
    %21 = tpu.iota {dimensions = array<i32: 0>} : vector<4x4xi32>
    %22 = tpu.iota {dimensions = array<i32: 1>} : vector<4x4xi32>
    %23 = arith.cmpf ogt, %20, %19 : vector<4x4xf32>
    %24 = arith.cmpf oeq, %20, %19 : vector<4x4xf32>
    %25 = arith.cmpi slt, %22, %21 : vector<4x4xi32>
    %26 = arith.andi %24, %25 : vector<4x4xi1>
    %27 = arith.ori %23, %26 : vector<4x4xi1>
    %28 = arith.extui %27 : vector<4x4xi1> to vector<4x4xi32>
    %cst_7 = arith.constant dense<0> : vector<4xi32>
    %29 = vector.multi_reduction <add>, %28, %cst_7 [1] : vector<4x4xi32> to vector<4xi32>
    %30 = vector.shape_cast %29 : vector<4xi32> to vector<4x1xi32>
    %c0_8 = arith.constant 0 : index
    %31 = memref.load %arg0[%c0_8] : memref<1xi32, #tpu.memory_space<smem>>
    %32 = vector.broadcast %31 : i32 to vector<4x1xi32>
    %33 = arith.cmpi slt, %30, %32 : vector<4x1xi32>
    %34 = arith.extui %33 : vector<4x1xi1> to vector<4x1xi32>
    %c0_9 = arith.constant 0 : index
    %c0_10 = arith.constant 0 : index
    %35 = vector.load %arg4[%c0_9, %c0_10] : memref<4x1xi32, #tpu.memory_space<vmem>>, vector<4x1xi32>
    tpu.vector_store %arg4[%c0_9, %c0_10], %34 {strides = array<i32>} : memref<4x1xi32, #tpu.memory_space<vmem>>, vector<4x1xi32>,
    %c0_11 = arith.constant 0 : index
    %c0_12 = arith.constant 0 : index
    %36 = vector.load %arg5[%c0_11, %c0_12] : memref<4x1xf32, #tpu.memory_space<vmem>>, vector<4x1xf32>
    tpu.vector_store %arg5[%c0_11, %c0_12], %17 {strides = array<i32>} : memref<4x1xf32, #tpu.memory_space<vmem>>, vector<4x1xf32>,
    return
  }
}

</mosaic_0001>

<bundles_post_ra>
// kernel: tpu_custom_call.1
= control target key start
LH: loop header
LB: loop body
LE: loop exit
PB: predicated region body
PF: predicated region fallthrough
CT: control target
= control target key end

     0   :  { %12 = vsyncpa [#allocation4], 0  ;;  %s165_s18 = smov [#allocation3]   ;;  %s218_s0 = inlined_call_operand.<no memory space> [shape: s32[1], index: 0, kind: input, shape index: {}]   ;;  %s219_s1 = inlined_call_operand.vmem [shape: f32[1,16], index: 1, kind: input, shape index: {}]   ;;  %s220_s2 = inlined_call_operand.hbm [shape: f32[4,16], index: 2, kind: input, shape index: {}]   ;;  %s221_s3 = inlined_call_operand.vmem [shape: f32[4,32], index: 3, kind: input, shape index: {}]   ;;  %s222_s4 = inlined_call_operand.vmem [shape: s32[4,1], index: 4, kind: output, shape index: {0}]   ;;  %s223_s5 = inlined_call_operand.vmem [shape: f32[4,1], index: 5, kind: output, shape index: {1}]  }
   0x1   :  { %s23_s19 = sshll.u32 %s165_s18, 4  ;;  %s24_s19 = int_to_ptr.vmem [resolvable:$true] %s23_s19 }
   0x2   :  { %s151_s20 = scalar_lea.vmem %s24_s19, 64  ;;  %p156_p1 = scmp.lt.s32.totalorder %s24_s19, %s24_s19 }
   0x3   :  { %p152_p0 = scmp.ne.s32.totalorder %s24_s19, %s151_s20  ;;  %p157_p2 = scmp.lt.s32.totalorder %s151_s20, %s151_s20 }
   0x5   :  { %p158_p3 = por %p157_p2, %p156_p1 }
   0x7   :  { %p159_p4 = pnand %p158_p3, %p152_p0 }
   0x9   :  { %162 = shalt.err (!%p159_p4)
}
   0xa   :  { %26 = dma.hbm_to_vmem [thread:$0]  %s220_s2, 64, %s24_s19, [#allocation4]  }
   0xb   :  { %163 = dma.done.wait [#allocation4], 64  }
   0xc   :  { %164 = vsyncadd [#allocation4], 4294967232  ;;  %v32_v0 = vld [vmem:[%s221_s3] sm:$0xf]  ;;  %s166_s25 = smov 112   ;;  %vm41_vm0 = vcmask 125952   ;;  %v93_v15 = vlaneseq  ;;  %v118_v31 = vstv %s218_s0 }
   0xd   :  { %47 = vrot.lane.b32.xlu0 %v32_v0, %s166_s25  ;;  %v133_v1 = vld [vmem:[%s219_s1] ss:$0 sm:$0xff]  ;;  %vm121_vm1 = vcmask 3072   ;;  %vm103_vm6 = vcmask 27648   ;;  %v167_v19 = vmov 0  }
   0xe   :  { %v40_v2 = vmul.f32 %v133_v1, %v32_v0  ;;  %v45_v4 = vld [vmem:[#allocation3] sm:$0xf]  ;;  %v94_v16 = vshrl.u32 %v93_v15, 7  ;;  %v96_v17 = vand.u32 127, %v93_v15 }
  0x10   :  { %v42_v3 = vsel %vm41_vm0, %v40_v2, 0.0  ;;  %vm99_vm2 = vcmp.lt.s32.totalorder %v96_v17, %v94_v16 }
  0x2c   :  { %43 = vadd.xlane.f32.xlu0 %v42_v3 }
  0x7f   :  { %v48_v5 = vpop.permute.xlu0 %47 }
  0x80   :  { %v50_v6 = vmul.f32 %v48_v5, %v45_v4 }
  0x82   :  { %v51_v7 = vsel %vm41_vm0, %v50_v6, 0.0 }
  0x83   :  { %52 = vadd.xlane.f32.xlu1 %v51_v7 }
  0xb5   :  { %v44_v8 = vpop.xlane.xlu0 %43 }
 0x10c   :  { %v53_v9 = vpop.xlane.xlu1 %52 }
 0x10d   :  { %v54_v10 = vadd.f32 %v53_v9, %v44_v8 }
 0x10f   :  { %v134_v11 = vmul.f32 -1.442695, %v54_v10 }
 0x111   :  { %139 = vpow2.f32 %v134_v11 }
 0x11e   :  { %v140_v12 = vpop.eup %139 }
 0x11f   :  { %v58_v13 = vadd.f32 1.0, %v140_v12 }
 0x121   :  { %141 = vrcp.f32 %v58_v13 }
 0x12e   :  { %v142_v14 = vpop.eup %141 }
 0x12f   :  { %61 = vxpose.xlu1.b32.start.end [1/1] (short) (narrow) %v142_v14, 8  ;;  %123 = vst.msk [vmem:[%s223_s5] sm:$0xf] %vm121_vm1, %v142_v14 }
 0x1ab   :  { %v77_v18 = vpop.trf.xlu1 }
 0x1ac   :  { %vm97_vm3 = vcmp.gt.f32.partialorder %v77_v18, %v142_v14  ;;  %vm98_vm4 = vcmp.eq.f32.partialorder %v77_v18, %v142_v14 }
 0x1ad   :  { %vm100_vm5 = vmand %vm98_vm4, %vm99_vm2 }
 0x1ae   :  { %vm101_vm7 = vmor %vm97_vm3, %vm100_vm5 }
 0x1af   :  { %v102_v20 = vsel %vm101_vm7, 1, %v167_v19 }
 0x1b0   :  { %v104_v21 = vsel %vm103_vm6, %v102_v20, 0 }
 0x1b1   :  { %v106_v22 = vshrl.u32 %v104_v21, 16  ;;  %v105_v24 = vand.u32 65535, %v104_v21 }
 0x1b3   :  { %v108_v23 = vcvt.s32.f32 %v106_v22  ;;  %v107_v25 = vcvt.s32.f32 %v105_v24 }
 0x1b5   :  { %111 = vadd.xlane.f32.xlu0 %v108_v23 }
 0x1b9   :  { %109 = vadd.xlane.f32.xlu0 %v107_v25 }
 0x23e   :  { %v112_v26 = vpop.xlane.xlu0 %111 }
 0x23f   :  { %v114_v27 = vcvt.f32.s32 %v112_v26 }
 0x241   :  { %v115_v29 = vshll.u32 %v114_v27, 16 }
 0x242   :  { %v110_v28 = vpop.xlane.xlu0 %109 }
 0x243   :  { %v113_v30 = vcvt.f32.s32 %v110_v28 }
 0x245   :  { %v116_v32 = vadd.s32 %v115_v29, %v113_v30 }
 0x247   :  { %vm119_vm8 = vcmp.lt.s32.totalorder %v116_v32, %v118_v31 }
 0x248   :  { %v120_v33 = vsel %vm119_vm8, 1, %v167_v19 }
 0x249   :  { %122 = vst.msk [vmem:[%s222_s4] sm:$0xf] %vm121_vm1, %v120_v33 }
 0x24a   :  { %132 = vsyncpa [#allocation4], 1 }

</bundles_post_ra>
